<compile_context>
chip_gen: v7x
topology: tpu7x:2x2x1
jax: 0.10.0
libtpu: 0.0.40
codegen_flags: <defaults>
</compile_context>

<pallas_src>
import functools

import jax
import jax.numpy as jnp
from jax.experimental import pallas as pl
from jax.experimental.pallas import tpu as pltpu

_EPS = 1e-6  # matches torch F.pairwise_distance default eps (added to the diff)


def _contrastive_loss_kernel(o1_ref, o2_ref, lab_ref, out_ref, acc_ref, *,
                             margin, block_rows, tiles_per_core, total_rows):
    c = pl.program_id(0)   # core-split index ("parallel"; size 1 on 1-TC chips)
    i = pl.program_id(1)   # tile index within this core's rows ("arbitrary")

    @pl.when(i == 0)
    def _init():
        acc_ref[...] = jnp.zeros_like(acc_ref)

    o1 = o1_ref[...].astype(jnp.float32)        # (TB, D)
    o2 = o2_ref[...].astype(jnp.float32)        # (TB, D)
    lab_row = lab_ref[0]                        # (1, TB), lane-dense f32

    # Per-row squared distance / hinge.  NOTE: no per-element masking of the
    # (TB, D) tile -- garbage tail rows of a partial last block may produce
    # NaN/Inf here, but the per-row selects below zero them (select does not
    # propagate NaN/Inf).
    diff = o1 - o2 + _EPS
    d2 = jnp.sum(diff * diff, axis=-1, keepdims=True)   # (TB, 1) squared distance
    d = jnp.sqrt(d2)
    hinge = jnp.maximum(margin - d, 0.0)
    h2 = hinge * hinge

    # Global row index of every row in this tile; rows >= total_rows are
    # padding (ragged last tile or clamped dummy tile) and must not contribute.
    tile_idx = c * tiles_per_core + i
    row_ids = tile_idx * block_rows + jax.lax.broadcasted_iota(
        jnp.int32, (block_rows, 1), 0)
    valid = row_ids < total_rows                         # (TB, 1) bool
    d2 = jnp.where(valid, d2, 0.0)
    h2 = jnp.where(valid, h2, 0.0)

    # sum_rows[(1-lab)*d2 + lab*h2] = sum(d2) + lab . (h2 - d2)
    # lab_row is lane-dense; the (1,TB)x(TB,1) dot runs on the idle MXU, so the
    # label never needs a strided DMA or a (TB,1) relayout.  Padded label rows
    # are exact zeros (wrapper pads with 0), and masked rows have h2-d2 == 0.
    pos_sum = jnp.sum(d2, keepdims=True)                               # (1, 1)
    lab_mix = jnp.dot(lab_row, h2 - d2,
                      preferred_element_type=jnp.float32)              # (1, 1)
    acc_ref[...] += pos_sum + lab_mix

    @pl.when(i == tiles_per_core - 1)
    def _finalize():
        # Lane-dense (1, 128) unmasked store of this core's partial sum.
        out_ref[...] = jnp.broadcast_to(acc_ref[...], out_ref.shape)


def _vmem_capacity_bytes():
    try:
        return int(pltpu.get_tpu_info().vmem_capacity_bytes)
    except Exception:
        return 64 * 1024 * 1024  # conservative fallback (v7x per-TC VMEM)


def _default_core_splits():
    # Only v7x has 2 TensorCores per chip; v5e/v6e are single-TC, where a
    # 2-way "parallel" split is just a serial loop plus a wasted dummy tile.
    try:
        kind = jax.devices()[0].device_kind.lower()
    except Exception:
        return 1
    return 2 if ("v7" in kind or "7x" in kind) else 1


def contrastive_loss(output1, output2, label, margin=2.0, *,
                     block_rows=None, num_core_splits=None):
    """output1, output2: (B, D); label: (B, 1) or (B,). Returns scalar f32 loss."""
    B, D = output1.shape
    assert output2.shape == (B, D)
    label = jnp.asarray(label)

    itemsize = jnp.dtype(output1.dtype).itemsize
    # dtype-aware sublane alignment: 8 rows (f32), 16 (bf16), 32 (int8/fp8)
    sub = {1: 32, 2: 16}.get(itemsize, 8)

    # --- generation-aware VMEM budget --------------------------------------
    vmem_cap = _vmem_capacity_bytes()            # 128 MiB v5e/v6e, 64 MiB v7x
    stream_budget = (vmem_cap * 3) // 8          # feature+label double-buffers
    vmem_limit = (vmem_cap * 3) // 4             # scoped-VMEM limit we request

    # --- tile-size selection (bandwidth-bound: biggest block that fits) -----
    if block_rows is None:
        d_pad = ((D + 127) // 128) * 128         # lane-padded feature width in VMEM
        # 2 feature inputs x 2 pipeline buffers (lane-padded) + lane-dense
        # label buffers (8 sublanes x 4 B x 2 buffers per row).
        bytes_per_row = 4 * d_pad * itemsize + 64
        tb = max(sub, stream_budget // bytes_per_row)
    else:
        tb = int(block_rows)
    if tb >= B:
        tb = B                       # block dim == full array dim: always legal
    else:
        tb = max(sub, (tb // sub) * sub)

    total_tiles = pl.cdiv(B, tb)

    nc = _default_core_splits() if num_core_splits is None else int(num_core_splits)
    nc = max(1, min(nc, total_tiles))
    tiles_per_core = pl.cdiv(total_tiles, nc)
    last_tile = total_tiles - 1

    # --- lane-dense label slab: (total_tiles, 1, tb), zero-padded -----------
    lab_flat = label.reshape(-1).astype(jnp.float32)
    pad = total_tiles * tb - B
    if pad:
        lab_flat = jnp.pad(lab_flat, (0, pad))
    lab3 = lab_flat.reshape(total_tiles, 1, tb)

    def feat_map(c, i):
        # Clamp so fully-out-of-range tiles (uneven core split) re-read the last
        # valid block; their rows are masked out inside the kernel.
        return (jnp.minimum(c * tiles_per_core + i, last_tile), 0)

    def lab_map(c, i):
        return (jnp.minimum(c * tiles_per_core + i, last_tile), 0, 0)

    kernel = functools.partial(
        _contrastive_loss_kernel,
        margin=float(margin),
        block_rows=tb,
        tiles_per_core=tiles_per_core,
        total_rows=B,
    )

    cost = pl.CostEstimate(
        flops=4 * B * D + 10 * B,
        transcendentals=B,
        bytes_accessed=2 * B * D * itemsize + B * 4 + nc * 128 * 4,
    )

    out = pl.pallas_call(
        kernel,
        out_shape=jax.ShapeDtypeStruct((1, nc * 128), jnp.float32),
        grid_spec=pltpu.PrefetchScalarGridSpec(
            num_scalar_prefetch=0,
            grid=(nc, tiles_per_core),
            in_specs=[
                pl.BlockSpec((tb, D), feat_map),
                pl.BlockSpec((tb, D), feat_map),
                pl.BlockSpec((1, 1, tb), lab_map),
            ],
            out_specs=pl.BlockSpec((1, 128), lambda c, i: (0, c)),
            scratch_shapes=[pltpu.VMEM((1, 1), jnp.float32)],
        ),
        compiler_params=pltpu.CompilerParams(
            dimension_semantics=("parallel", "arbitrary"),
            vmem_limit_bytes=int(vmem_limit),
        ),
        cost_estimate=cost,
    )(output1, output2, lab3)

    partial_sums = out.reshape(nc, 128)[:, 0]   # one partial sum per core split
    return jnp.sum(partial_sums) / B            # divide by true B once


def _reference(output1, output2, label, margin=2.0):
    # Pure-JAX reference mirroring the PyTorch forward.
    d = jnp.sqrt(jnp.sum((output1 - output2 + _EPS) ** 2, axis=-1, keepdims=True))
    return jnp.mean((1.0 - label) * d**2 + label * jnp.maximum(margin - d, 0.0) ** 2)


if __name__ == "__main__":
    key = jax.random.PRNGKey(0)
    k1, k2, k3 = jax.random.split(key, 3)

    # Small shapes; block_rows=8 forces a multi-tile grid.
    B, D = 64, 32
    output1 = jax.random.normal(k1, (B, D), dtype=jnp.float32)
    output2 = jax.random.normal(k2, (B, D), dtype=jnp.float32)
    label = jax.random.bernoulli(k3, 0.5, (B, 1)).astype(jnp.float32)
    ref = _reference(output1, output2, label, margin=2.0)

    loss = jax.block_until_ready(
        contrastive_loss(output1, output2, label, margin=2.0, block_rows=8))
    assert jnp.allclose(loss, ref, rtol=1e-5, atol=1e-5), (loss, ref)

    # Ragged batch: exercises partial-tile masking + zero-padded label slab.
    B2 = 50
    o1b = jax.random.normal(k1, (B2, D), dtype=jnp.float32)
    o2b = jax.random.normal(k2, (B2, D), dtype=jnp.float32)
    labb = jax.random.bernoulli(k3, 0.5, (B2, 1)).astype(jnp.float32)
    ref2 = _reference(o1b, o2b, labb, margin=2.0)
    loss2 = jax.block_until_ready(
        contrastive_loss(o1b, o2b, labb, margin=2.0, block_rows=16))
    assert jnp.allclose(loss2, ref2, rtol=1e-5, atol=1e-5), (loss2, ref2)

    # Forced 2-way core split with an odd tile count: exercises the clamped
    # dummy-tile path (works on any generation; it just loops on 1-TC chips).
    B3 = 40
    o1c = jax.random.normal(k1, (B3, D), dtype=jnp.float32)
    o2c = jax.random.normal(k2, (B3, D), dtype=jnp.float32)
    labc = jax.random.bernoulli(k3, 0.5, (B3, 1)).astype(jnp.float32)
    ref3 = _reference(o1c, o2c, labc, margin=2.0)
    loss3 = jax.block_until_ready(
        contrastive_loss(o1c, o2c, labc, margin=2.0, block_rows=16,
                         num_core_splits=2))
    assert jnp.allclose(loss3, ref3, rtol=1e-5, atol=1e-5), (loss3, ref3)

    # Auto tile-size / auto core-split path (tb clamps to the full small batch).
    loss4 = jax.block_until_ready(
        contrastive_loss(output1, output2, label, margin=2.0))
    assert jnp.allclose(loss4, ref, rtol=1e-5, atol=1e-5), (loss4, ref)

    print("KERNEL_OK")
</pallas_src>

<mosaic_0001>
module attributes {stable_mosaic.version = 11 : i64} {
  func.func @_contrastive_loss_kernel(%arg0: i32, %arg1: i32, %arg2: memref<8x32xf32, #tpu.memory_space<vmem>>, %arg3: memref<8x32xf32, #tpu.memory_space<vmem>>, %arg4: memref<1x1x8xf32, #tpu.memory_space<vmem>>, %arg5: memref<1x128xf32, #tpu.memory_space<vmem>>, %arg6: memref<1x1xf32, #tpu.memory_space<vmem>>) attributes {dimension_semantics = [#tpu.dimension_semantics<parallel>, #tpu.dimension_semantics<arbitrary>], iteration_bounds = array<i64: 1, 8>, scalar_prefetch = 0 : i64, scratch_operands = 1 : i64, tpu.core_type = #tpu.core_type<tc>, window_params = [{transform_indices = @transform_0, window_bounds = array<i64: 8, 32>}, {transform_indices = @transform_1, window_bounds = array<i64: 8, 32>}, {transform_indices = @transform_2, window_bounds = array<i64: 1, 1, 8>}, {transform_indices = @transform_3, window_bounds = array<i64: 1, 128>}]} {
    %c0_i32 = arith.constant 0 : i32
    %0 = arith.cmpi eq, %arg1, %c0_i32 : i32
    %1 = arith.extui %0 : i1 to i32
    %c0_i32_0 = arith.constant 0 : i32
    %2 = arith.cmpi ne, %1, %c0_i32_0 : i32
    scf.if %2 {
      %cst_20 = arith.constant 0.000000e+00 : f32
      %45 = vector.broadcast %cst_20 : f32 to vector<1x1xf32>
      %c0_21 = arith.constant 0 : index
      %c0_22 = arith.constant 0 : index
      %46 = vector.load %arg6[%c0_21, %c0_22] : memref<1x1xf32, #tpu.memory_space<vmem>>, vector<1x1xf32>
      tpu.vector_store %arg6[%c0_21, %c0_22], %45 {strides = array<i32>} : memref<1x1xf32, #tpu.memory_space<vmem>>, vector<1x1xf32>,
    } else {
    }
    %c0 = arith.constant 0 : index
    %c0_1 = arith.constant 0 : index
    %3 = vector.load %arg2[%c0, %c0_1] : memref<8x32xf32, #tpu.memory_space<vmem>>, vector<8x32xf32>
    %c0_2 = arith.constant 0 : index
    %c0_3 = arith.constant 0 : index
    %4 = vector.load %arg3[%c0_2, %c0_3] : memref<8x32xf32, #tpu.memory_space<vmem>>, vector<8x32xf32>
    %c0_4 = arith.constant 0 : index
    %c0_5 = arith.constant 0 : index
    %c0_6 = arith.constant 0 : index
    %5 = vector.load %arg4[%c0_4, %c0_5, %c0_6] : memref<1x1x8xf32, #tpu.memory_space<vmem>>, vector<1x1x8xf32>
    %6 = vector.shape_cast %5 : vector<1x1x8xf32> to vector<1x8xf32>
    %7 = arith.subf %3, %4 : vector<8x32xf32>
    %cst = arith.constant 9.99999997E-7 : f32
    %8 = vector.broadcast %cst : f32 to vector<8x32xf32>
    %9 = arith.addf %7, %8 : vector<8x32xf32>
    %10 = arith.mulf %9, %9 : vector<8x32xf32>
    %cst_7 = arith.constant dense<0.000000e+00> : vector<8xf32>
    %11 = vector.multi_reduction <add>, %10, %cst_7 [1] : vector<8x32xf32> to vector<8xf32>
    %12 = vector.shape_cast %11 : vector<8xf32> to vector<8x1xf32>
    %13 = math.sqrt %12 : vector<8x1xf32>
    %cst_8 = arith.constant 2.000000e+00 : f32
    %14 = vector.broadcast %cst_8 : f32 to vector<8x1xf32>
    %15 = arith.subf %14, %13 : vector<8x1xf32>
    %cst_9 = arith.constant 0.000000e+00 : f32
    %16 = vector.broadcast %cst_9 : f32 to vector<8x1xf32>
    %17 = arith.maximumf %15, %16 : vector<8x1xf32>
    %18 = arith.mulf %17, %17 : vector<8x1xf32>
    %c8_i32 = arith.constant 8 : i32
    %19 = arith.muli %arg0, %c8_i32 : i32
    %20 = arith.addi %19, %arg1 : i32
    %c8_i32_10 = arith.constant 8 : i32
    %21 = arith.muli %20, %c8_i32_10 : i32
    %22 = tpu.iota {dimensions = array<i32: 0>} : vector<8x1xi32>
    %23 = vector.broadcast %21 : i32 to vector<8x1xi32>
    %24 = arith.addi %23, %22 : vector<8x1xi32>
    %c64_i32 = arith.constant 64 : i32
    %25 = vector.broadcast %c64_i32 : i32 to vector<8x1xi32>
    %26 = arith.cmpi slt, %24, %25 : vector<8x1xi32>
    %cst_11 = arith.constant 0.000000e+00 : f32
    %27 = vector.broadcast %cst_11 : f32 to vector<8x1xf32>
    %28 = arith.select %26, %12, %27 : vector<8x1xi1>, vector<8x1xf32>
    %cst_12 = arith.constant 0.000000e+00 : f32
    %29 = vector.broadcast %cst_12 : f32 to vector<8x1xf32>
    %30 = arith.select %26, %18, %29 : vector<8x1xi1>, vector<8x1xf32>
    %31 = vector.shape_cast %28 : vector<8x1xf32> to vector<1x8x1xf32>
    %cst_13 = arith.constant dense<0.000000e+00> : vector<1xf32>
    %32 = vector.multi_reduction <add>, %31, %cst_13 [1, 2] : vector<1x8x1xf32> to vector<1xf32>
    %33 = vector.shape_cast %32 : vector<1xf32> to vector<1x1x1xf32>
    %34 = vector.extract %33[0, 0, 0] : f32 from vector<1x1x1xf32>
    %35 = vector.broadcast %34 : f32 to vector<1x1xf32>
    %36 = arith.subf %30, %28 : vector<8x1xf32>
    %cst_14 = arith.constant dense<0.000000e+00> : vector<1x1xf32>
    %37 = tpu.matmul %6, %36, %cst_14 {dimension_numbers = #tpu.dot_dimension_numbers<[1], [0], [0], [1], [0, 0, 1, 1], [], []>} : vector<1x8xf32>, vector<8x1xf32>, vector<1x1xf32> -> vector<1x1xf32>
    %c0_15 = arith.constant 0 : index
    %c0_16 = arith.constant 0 : index
    %38 = vector.load %arg6[%c0_15, %c0_16] : memref<1x1xf32, #tpu.memory_space<vmem>>, vector<1x1xf32>
    %39 = arith.addf %35, %37 : vector<1x1xf32>
    %40 = arith.addf %38, %39 : vector<1x1xf32>
    %c0_17 = arith.constant 0 : index
    %c0_18 = arith.constant 0 : index
    %41 = vector.load %arg6[%c0_17, %c0_18] : memref<1x1xf32, #tpu.memory_space<vmem>>, vector<1x1xf32>
    tpu.vector_store %arg6[%c0_17, %c0_18], %40 {strides = array<i32>} : memref<1x1xf32, #tpu.memory_space<vmem>>, vector<1x1xf32>,
    %c7_i32 = arith.constant 7 : i32
    %42 = arith.cmpi eq, %arg1, %c7_i32 : i32
    %43 = arith.extui %42 : i1 to i32
    %c0_i32_19 = arith.constant 0 : i32
    %44 = arith.cmpi ne, %43, %c0_i32_19 : i32
    scf.if %44 {
      %c0_20 = arith.constant 0 : index
      %c0_21 = arith.constant 0 : index
      %45 = vector.load %arg6[%c0_20, %c0_21] : memref<1x1xf32, #tpu.memory_space<vmem>>, vector<1x1xf32>
      %46 = vector.shape_cast %45 : vector<1x1xf32> to vector<1x1xf32>
      %47 = vector.broadcast %46 : vector<1x1xf32> to vector<1x128xf32>
      %c0_22 = arith.constant 0 : index
      %c0_23 = arith.constant 0 : index
      %48 = vector.load %arg5[%c0_22, %c0_23] : memref<1x128xf32, #tpu.memory_space<vmem>>, vector<1x128xf32>
      tpu.vector_store %arg5[%c0_22, %c0_23], %47 {strides = array<i32>} : memref<1x128xf32, #tpu.memory_space<vmem>>, vector<1x128xf32>,
    } else {
    }
    return
  }
  func.func @transform_0(%arg0: i32, %arg1: i32) -> (i32, i32) {
    %c8_i32 = arith.constant 8 : i32
    %0 = arith.muli %arg0, %c8_i32 : i32
    %1 = arith.addi %0, %arg1 : i32
    %c7_i32 = arith.constant 7 : i32
    %2 = arith.minsi %1, %c7_i32 : i32
    %c0_i32 = arith.constant 0 : i32
    %c0_i32_0 = arith.constant 0 : i32
    return %2, %c0_i32 : i32, i32
  }
  func.func @transform_1(%arg0: i32, %arg1: i32) -> (i32, i32) {
    %c8_i32 = arith.constant 8 : i32
    %0 = arith.muli %arg0, %c8_i32 : i32
    %1 = arith.addi %0, %arg1 : i32
    %c7_i32 = arith.constant 7 : i32
    %2 = arith.minsi %1, %c7_i32 : i32
    %c0_i32 = arith.constant 0 : i32
    %c0_i32_0 = arith.constant 0 : i32
    return %2, %c0_i32 : i32, i32
  }
  func.func @transform_2(%arg0: i32, %arg1: i32) -> (i32, i32, i32) {
    %c8_i32 = arith.constant 8 : i32
    %0 = arith.muli %arg0, %c8_i32 : i32
    %1 = arith.addi %0, %arg1 : i32
    %c7_i32 = arith.constant 7 : i32
    %2 = arith.minsi %1, %c7_i32 : i32
    %c0_i32 = arith.constant 0 : i32
    %c0_i32_0 = arith.constant 0 : i32
    %c0_i32_1 = arith.constant 0 : i32
    return %2, %c0_i32, %c0_i32_0 : i32, i32, i32
  }
  func.func @transform_3(%arg0: i32, %arg1: i32) -> (i32, i32) {
    %c0_i32 = arith.constant 0 : i32
    %c0_i32_0 = arith.constant 0 : i32
    return %c0_i32, %arg0 : i32, i32
  }
}

</mosaic_0001>

<bundles_post_ra>
// kernel: tpu_custom_call.1
= control target key start
LH: loop header
LB: loop body
LE: loop exit
PB: predicated region body
PF: predicated region fallthrough
CT: control target
= control target key end

     0   :  { %8 = vsyncpa [#allocation4], 0  ;;  %s658_s12 = smov 0   ;;  %s660_s13 = smov 0   ;;  %s741_s0 = inlined_call_operand.vmem [shape: f32[64,32], index: 0, kind: input, shape index: {}]   ;;  %s742_s1 = inlined_call_operand.vmem [shape: f32[64,32], index: 1, kind: input, shape index: {}]   ;;  %s743_s2 = inlined_call_operand.vmem [shape: f32[8,1,8], index: 2, kind: input, shape index: {}]   ;;  %s744_s3 = inlined_call_operand.hbm [shape: f32[1,128], index: 3, kind: output, shape index: {}]  }
   0x1   :  { %s662_s14 = smov 0  }
   0x2 LB: > { %s509_s15 = sadd.s32 4294967295, %s631_s14   ;;  %s23_s16 = sadd.s32 1, %s627_s13  ;;  %s631_s14 = sphi %s662_s14, %s14_s14   ;;  %s627_s13 = sphi %s660_s13, %s747_s13   ;;  %s623_s12 = sphi %s658_s12, %s746_s12  }
   0x3   : > { %p24_p0 = scmp.ge.s32.totalorder %s23_s16, 8  ;;  %p512_p1 = scmp.ge.s32.totalorder %s631_s14, 1 }
   0x4   : > { %p214_p2 = scmp.lt.s32.totalorder %s631_s14, 9 }
   0x5   : > { %s749_s16 = smov (%p24_p0, %s23_s16), 0 }
   0x6   : > { %p215_p3 = pnand %p512_p1, %p214_p2 }
   0x7   : > { %p253_p4 = scmp.lt.s32.totalorder (!%p215_p3), %s623_s12, 7  ;;  %p524_p5 = scmp.ne.s32.totalorder (!%p215_p3), %s623_s12, 0 }
   0x8   : > { %218 = sbr.rel (%p215_p3) target bundleno = 579 (0x243), region = 32 }
   0xf   : > { %s254_s17 = scalar_select %p253_p4, %s623_s12, 7 }
  0x10   : > { %289 = sbr.rel (%p524_p5) target bundleno = 23 (0x17), region = 36  ;;  %vm290_vm0 = vcmask (!%p524_p5), 0   ;;  %v633_v0 = vmov (!%p524_p5), 0.0  }
  0x11   : > { %s751_s17 = smov (!%p253_p4, %s254_s17), 7  ;;  %291 = vst.msk [vmem:[#allocation2] sm:$0x1] (!%p524_p5), %vm290_vm0, %v633_v0 }
  0x12   : > { %s516_s18 = sshll.u32 %s751_s17, 3  ;;  %s281_s21 = scalar_lea.vmem %s743_s2, %s751_s17 }
  0x13   : > { %s258_s24 = scalar_lea.vmem %s741_s0, %s516_s18  ;;  %s270_s27 = scalar_lea.vmem %s742_s1, %s516_s18 }
  0x17 PF: > { %v292_v1 = vld [vmem:[%s258_s24] sm:$0xff]  ;;  %vm298_vm1 = vcmask 261120   ;;  %v634_v7 = vmov 0.0   ;;  %vm635_vm2 = vmmov 0   ;;  %v315_v8 = vlaneseq  ;;  %s525_s28 = sshll.u32 %s623_s12, 3  ;;  %p527_p6 = scmp.ne.s32.totalorder %s623_s12, 7 }
  0x18   : > { %v293_v2 = vld [vmem:[%s270_s27] sm:$0xff]  ;;  %534 = vmatprep.subr.mxu0 %v634_v7  ;;  %536 = vmatprep.mubr.msk.f32.mxu0 %vm635_vm2, %v634_v7  ;;  %v317_v10 = vstv %s525_s28  ;;  %vm322_vm4 = vcmask 7168   ;;  %vm335_vm7 = vcmask 64512   ;;  %vm412_vm8 = vcmask 0  }
  0x19   : > { %v295_v3 = vsub.f32 %v292_v1, %v293_v2  ;;  %v316_v9 = vshrl.u32 %v315_v8, 7  ;;  %v294_v25 = vld [vmem:[%s281_s21] sm:$0x1]  ;;  %v636_v40 = vmov (!%p527_p6), 0  }
  0x1a   : > { %v409_v35 = vld [vmem:[#allocation2] sm:$0x1]  ;;  %578 = vset.pattern.permute.xlu0 (!%p527_p6), %v636_v40 }
  0x1b   : > { %v296_v4 = vadd.f32 1e-06, %v295_v3  ;;  %v318_v11 = vadd.s32 %v317_v10, %v316_v9  ;;  %v426_v41 = vsub.s32 (!%p527_p6), 0, %v316_v9 }
  0x1d   : > { %v297_v5 = vmul.f32 %v296_v4, %v296_v4  ;;  %vm319_vm3 = vcmp.lt.s32.totalorder %v318_v11, 64 }
  0x1f   : > { %v299_v6 = vsel %vm298_vm1, %v297_v5, 0.0 }
  0x20   : > { %300 = vadd.xlane.f32.xlu0 %v299_v6 }
  0xad   : > { %v301_v12 = vpop.xlane.xlu0 %300 }
  0xae   : > { %576 = vrsqrt.f32 %v301_v12  ;;  %v320_v13 = vsel %vm319_vm3, %v301_v12, 0.0  ;;  %vm304_vm5 = vcmp.eq.f32.partialorder %v301_v12, inf  ;;  %v307_v17 = vand.u32 2147483648, %v301_v12 }
  0xaf   : > { %v323_v14 = vsel %vm322_vm4, %v320_v13, 0.0  ;;  %vm306_vm6 = vcmp.eq.f32.partialorder %v301_v12, 0.0 }
  0xb0   : > { %324 = vadd.xlane.f32.xlu0 %v323_v14 }
  0xb8   : > { %v577_v15 = vpop.eup %576 }
  0xb9   : > { %v303_v16 = vmul.f32 %v577_v15, %v301_v12 }
  0xbb   : > { %v305_v18 = vsel %vm304_vm5, %v301_v12, %v303_v16 }
  0xbc   : > { %v308_v19 = vsel %vm306_vm6, %v307_v17, %v305_v18 }
  0xbd   : > { %v309_v20 = vsub.f32 2.0, %v308_v19 }
  0xbf   : > { %v310_v21 = vmax.f32 %v309_v20, 0.0 }
  0xc1   : > { %v311_v22 = vmul.f32 %v310_v21, %v310_v21 }
  0xc3   : > { %v321_v23 = vsel %vm319_vm3, %v311_v22, 0.0 }
  0xc4   : > { %v334_v24 = vsub.f32 %v321_v23, %v320_v13 }
  0xc6   : > { %535 = vmatpush3.msra.mxu0 %v334_v24 }
  0xc7   : > { %537 = vmatmul.mubr.msk.f32.vlgmr.msra.gmra.mrb[0].mxu0 %vm335_vm7, %v294_v25 }
 0x13d   : > { %v325_v26 = vpop.xlane.xlu0 %324 }
 0x13e   : > { %v326_v27 = vrot.slane %v325_v26, 4 }
 0x140   : > { %v327_v28 = vadd.f32 %v326_v27, %v325_v26 }
 0x142   : > { %v328_v29 = vrot.slane %v327_v28, 2 }
 0x144   : > { %v329_v30 = vadd.f32 %v328_v29, %v327_v28 }
 0x146   : > { %v330_v31 = vrot.slane %v329_v30, 1 }
 0x148   : > { %v331_v32 = vadd.f32 %v330_v31, %v329_v30 }
 0x14a   : > { %539 = vpush %v331_v32 }
 0x17b   : > { %s540_s4 = spop %539 }
 0x17c   : > { %v333_v33 = vstv %s540_s4 }
 0x199   : > { %417 = sbr.rel (%p527_p6) target bundleno = 554 (0x22a), region = 40 }
 0x19a   : > { %v405_v34 = vpop.f32.mrb[0].mxu0 }
 0x19b   : > { %v410_v36 = vadd.f32 %v405_v34, %v333_v33  ;;  %v538_v37 = vpop.f32.mrb[1].mxu0 }
 0x19d   : > { %v411_v38 = vadd.f32 %v410_v36, %v409_v35 }
 0x19f   : > { %413 = vst.msk [vmem:[#allocation2] sm:$0x1] %vm412_vm8, %v411_v38 }
 0x1a6   : > { %v418_v39 = vld [vmem:[#allocation2] sm:$0x1] }
 0x1a7   : > { %421 = vperm.xlu0 %578, %v418_v39  }
 0x226   : > { %v422_v42 = vpop.permute.xlu0 %421 }
 0x227   : > { %v427_v43 = vrot.slane %v422_v42, %v426_v41 }
 0x229   : > { %428 = vst [vmem:[#allocation3] sm:$0x1] %v427_v43 }
 0x22a PF: > { %p706_p7 = scmp.eq.s32.totalorder %s509_s15, 7  ;;  %s637_s6 = smov [#allocation3]  }
 0x22b   : > { %s438_s7 = sshll.u32 %s637_s6, 4  ;;  %s439_s7 = int_to_ptr.vmem [resolvable:$true] %s438_s7 }
 0x22c   : > { %s579_s8 = scalar_lea.vmem %s439_s7, 16  ;;  %s585_s9 = scalar_lea.vmem %s439_s7, 32 }
 0x22d   : > { %p580_p8 = scmp.ne.s32.totalorder %s439_s7, %s579_s8  ;;  %p586_p11 = scmp.lt.s32.totalorder %s439_s7, %s439_s7 }
 0x22e   : > { %p587_p12 = scmp.lt.s32.totalorder %s585_s9, %s579_s8 }
 0x22f   : > { %p581_p9 = pnand %p580_p8, %p706_p7 }
 0x230   : > { %p588_p13 = por %p587_p12, %p586_p11 }
 0x231   : > { %p582_p10 = pneg %p581_p9 }
 0x233   : > { %p589_p0 = pnand %p588_p13, %p582_p10 }
 0x235   : > { %592 = shalt.err (!%p589_p0)
}
 0x236   : > { %s593_s12 = scalar_lea.hbm %s744_s3, 16 }
 0x237   : > { %p594_p1 = scmp.ne.s32.totalorder %s744_s3, %s593_s12  ;;  %p599_p4 = scmp.lt.u32.totalorder %s593_s12, %s744_s3 }
 0x239   : > { %p595_p2 = pnand %p594_p1, %p706_p7 }
 0x23b   : > { %p596_p3 = pneg %p595_p2 }
 0x23d   : > { %p601_p5 = pnand %p599_p4, %p596_p3 }
 0x23f   : > { %604 = shalt.err (!%p601_p5)
}
 0x240   : > { %542 = dma.vmem_to_hbm [thread:$0]  (%p706_p7), %s439_s7, 16, %s744_s3, [#allocation4]  }
 0x241   : > { %618 = dma.done.wait (%p706_p7), [#allocation4], 16  }
 0x242   : > { %620 = vsyncadd (%p706_p7), [#allocation4], 4294967280 }
 0x243 PF: > { %s14_s14 = sadd.s32 1, %s631_s14   ;;  %s746_s12 = smov %s627_s13 }
 0x244   : > { %p11_p6 = scmp.ge.s32.totalorder %s14_s14, 10   ;;  %s747_s13 = smov %s749_s16 }
 0x246   :  { %13 = sbr.rel (!%p11_p6) target bundleno = 2 (0x2), region = 74 }
 0x24d   :  { %451 = vsyncpa [#allocation4], 1 }
 0x24e   :  { %453 = vsyncpa [#allocation4 + $0x1], 1 }

</bundles_post_ra>
